<compile_context>
chip_gen: v5e
topology: v5e:2x2
jax: 0.10.0
libtpu: 0.0.40
codegen_flags: <defaults>
</compile_context>

<pallas_src>
import functools
import math

import jax
import jax.numpy as jnp
from jax.experimental import pallas as pl
from jax.experimental.pallas import tpu as pltpu

# ---- module hyper-parameters (defaults of the PyTorch module) -------------
ALPHA = 0.25    # FocalLoss alpha
GAMMA = 2       # FocalLoss gamma (fixed at 2 -> explicit square below)
EPS = 0.01      # label-smoothing eps
LAM = 0.5       # SuperLoss lambda
# reduction = 'mean'; classes = C (taken from the logits' last dim)


def _lambertw0(z):
    """Principal-branch Lambert W for z >= -1/e, elementwise (VPU/EUP ops).

    Branch-point series guess near -1/e, log1p guess for larger z, then 4
    Halley iterations (cubic convergence -> ample for f32).
    """
    e = jnp.float32(math.e)
    p = jnp.sqrt(jnp.maximum(2.0 * (e * z + 1.0), 0.0))
    w_branch = -1.0 + p - p * p * jnp.float32(1.0 / 3.0) + jnp.float32(11.0 / 72.0) * p * p * p
    w_pos = jnp.log1p(jnp.maximum(z, 0.0))
    w = jnp.where(z < 0.25, w_branch, w_pos)
    for _ in range(4):
        ew = jnp.exp(w)
        f = w * ew - z
        wp1 = w + 1.0
        # Halley step; numerator/denominator scaled by (w+1) so the branch
        # point (w == -1) stays finite.
        den = ew * wp1 * wp1 - 0.5 * (w + 2.0) * f
        w = w - (f * wp1) / jnp.where(den == 0.0, 1.0, den)
    return w


def _loss_kernel(logits_ref, target_ref, loss_ref, exps_ref, *, b_actual, n_classes):
    i = pl.program_id(0)
    tb = logits_ref.shape[0]
    C = n_classes

    @pl.when(i == 0)
    def _init():
        loss_ref[...] = jnp.zeros_like(loss_ref)   # accumulates sum of smooth term
        exps_ref[...] = jnp.zeros_like(exps_ref)   # accumulates sum of super loss

    logits = logits_ref[...].astype(jnp.float32)   # (TB, C), cast in-kernel
    tgt = target_ref[...]                          # (TB, 1) int32

    # mask padded rows of the last tile
    row = jax.lax.broadcasted_iota(jnp.int32, (tb, 1), 0) + i * tb
    valid = row < b_actual

    # ---- single softmax pass ----------------------------------------------
    m = jnp.max(logits, axis=-1, keepdims=True)
    sh = logits - m                                               # (TB, C)
    lse = jnp.log(jnp.sum(jnp.exp(sh), axis=-1, keepdims=True))   # (TB, 1)
    row_sum = jnp.sum(sh, axis=-1, keepdims=True)                 # (TB, 1)

    # label-smoothing term per sample: -sum_c log_softmax = C*lse - sum_c sh
    neg_lp_sum = jnp.float32(C) * lse - row_sum                   # (TB, 1)

    # FocalLoss(Superloss=True)(log_preds, target).  The reference applies
    # log_softmax again inside F.cross_entropy, which is an identity on
    # log-probabilities, so ce = -log_preds[target] = lse - sh[target].
    col = jax.lax.broadcasted_iota(jnp.int32, (tb, C), 1)
    onehot = col == tgt
    sh_t = jnp.sum(jnp.where(onehot, sh, 0.0), axis=-1, keepdims=True)
    ce = lse - sh_t                                               # (TB, 1)

    pt = jnp.exp(-ce)
    d = 1.0 - pt
    focal = jnp.float32(ALPHA) * d * d * ce                       # gamma = 2

    # ---- SuperLoss ----------------------------------------------------------
    # TODO(synk): for very large batch tiles, lane-pack this (TB,1) section
    #             into (TB//128, 128) to raise lane utilization of the
    #             Lambert-W iteration; at the tile sizes used here the (TB,C)
    #             softmax work dominates.
    tau = jnp.float32(math.log(C))
    cl = focal - tau
    y = 0.5 * jnp.maximum(jnp.float32(-2.0 / math.e), cl * jnp.float32(1.0 / LAM))
    w = _lambertw0(y)
    sigma = jnp.exp(-w)
    sl = cl * sigma + jnp.float32(LAM) * (w * w)   # log(sigma) == -w

    zero = jnp.float32(0.0)
    loss_ref[...] += jnp.sum(jnp.where(valid, neg_lp_sum, zero), keepdims=True)
    exps_ref[...] += jnp.sum(jnp.where(valid, sl, zero), keepdims=True)

    @pl.when(i == pl.num_programs(0) - 1)
    def _finalize():
        inv_b = jnp.float32(1.0 / b_actual)
        smooth_mean = loss_ref[...] * inv_b
        super_mean = exps_ref[...] * inv_b
        loss_ref[...] = smooth_mean * jnp.float32(EPS / C) + jnp.float32(1.0 - EPS) * super_mean
        exps_ref[...] = jnp.exp(super_mean)


def _round_up(x, m):
    return (x + m - 1) // m * m


def label_smoothing_super_loss(logits, target, *, tb=None):
    """logits: (B, C) float (any dtype), target: (B,) int class indices.

    Returns (loss_cls, exp(super_loss_mean)) as scalars, matching the intended
    PyTorch forward with reduction='mean'.
    """
    B, C = logits.shape
    itemsize = jnp.dtype(logits.dtype).itemsize
    if tb is None:
        # cap the per-buffer logits tile at ~4 MiB so the double-buffered
        # footprint fits v5e's 16 MiB scoped VMEM and v7x's 64 MiB physical.
        cap = max(8, ((4 * 1024 * 1024) // max(1, C * itemsize)) // 8 * 8)
        tb = min(512, cap, _round_up(B, 8))

    b_pad = _round_up(B, tb)
    if b_pad != B:
        logits = jnp.pad(logits, ((0, b_pad - B), (0, 0)))
        target = jnp.pad(target, ((0, b_pad - B),))
    target2d = target.astype(jnp.int32).reshape(b_pad, 1)

    loss_cls, exp_super = pl.pallas_call(
        functools.partial(_loss_kernel, b_actual=B, n_classes=C),
        out_shape=(jax.ShapeDtypeStruct((1, 1), jnp.float32),
                   jax.ShapeDtypeStruct((1, 1), jnp.float32)),
        grid=(b_pad // tb,),
        in_specs=[pl.BlockSpec((tb, C), lambda i: (i, 0)),
                  pl.BlockSpec((tb, 1), lambda i: (i, 0))],
        out_specs=(pl.BlockSpec((1, 1), lambda i: (0, 0)),
                   pl.BlockSpec((1, 1), lambda i: (0, 0))),
        compiler_params=pltpu.CompilerParams(dimension_semantics=("arbitrary",)),
    )(logits, target2d)
    return loss_cls[0, 0], exp_super[0, 0]


def _reference(logits, target):
    """Pure-JAX reference of the intended forward (for a sanity check)."""
    logits = logits.astype(jnp.float32)
    B, C = logits.shape
    log_preds = jax.nn.log_softmax(logits, axis=-1)
    smooth = jnp.mean(-jnp.sum(log_preds, axis=-1))
    ce = -jnp.take_along_axis(log_preds, target.reshape(B, 1).astype(jnp.int32), axis=-1)[:, 0]
    pt = jnp.exp(-ce)
    focal = ALPHA * (1.0 - pt) ** 2 * ce
    tau = jnp.float32(math.log(C))
    cl = focal - tau
    y = 0.5 * jnp.maximum(jnp.float32(-2.0 / math.e), cl / LAM)
    w = _lambertw0(y)
    sigma = jnp.exp(-w)
    sl = cl * sigma + LAM * jnp.log(sigma) ** 2
    super_mean = jnp.mean(sl)
    loss_cls = smooth * EPS / C + (1.0 - EPS) * super_mean
    return loss_cls, jnp.exp(super_mean)


if __name__ == "__main__":
    key = jax.random.PRNGKey(0)
    k1, k2 = jax.random.split(key)
    B, C = 8, 10  # classes=10 is the module default
    logits = jax.random.normal(k1, (B, C), dtype=jnp.float32)
    target = jax.random.randint(k2, (B,), 0, C, dtype=jnp.int32)

    loss_cls, exp_super = label_smoothing_super_loss(logits, target)
    jax.block_until_ready((loss_cls, exp_super))

    ref_loss, ref_exp = _reference(logits, target)
    assert bool(jnp.isfinite(loss_cls)) and bool(jnp.isfinite(exp_super))
    assert bool(jnp.abs(loss_cls - ref_loss) <= 1e-3 * (1.0 + jnp.abs(ref_loss)))
    assert bool(jnp.abs(exp_super - ref_exp) <= 1e-3 * (1.0 + jnp.abs(ref_exp)))
    print("KERNEL_OK")
</pallas_src>

<mosaic_0001>
module attributes {stable_mosaic.version = 11 : i64} {
  func.func @_loss_kernel(%arg0: i32, %arg1: memref<8x10xf32, #tpu.memory_space<vmem>>, %arg2: memref<8x1xi32, #tpu.memory_space<vmem>>, %arg3: memref<1x1xf32, #tpu.memory_space<vmem>>, %arg4: memref<1x1xf32, #tpu.memory_space<vmem>>) attributes {dimension_semantics = [#tpu.dimension_semantics<arbitrary>], iteration_bounds = array<i64: 1>, scalar_prefetch = 0 : i64, scratch_operands = 0 : i64, tpu.core_type = #tpu.core_type<tc>, window_params = [{transform_indices = @transform_0, window_bounds = array<i64: 8, 10>}, {transform_indices = @transform_1, window_bounds = array<i64: 8, 1>}, {pipeline_mode = #tpu.pipeline_mode<synchronous>, transform_indices = @transform_2, window_bounds = array<i64: 1, 1>}, {pipeline_mode = #tpu.pipeline_mode<synchronous>, transform_indices = @transform_3, window_bounds = array<i64: 1, 1>}]} {
    %c0_i32 = arith.constant 0 : i32
    %0 = arith.cmpi eq, %arg0, %c0_i32 : i32
    %1 = arith.extui %0 : i1 to i32
    %c0_i32_0 = arith.constant 0 : i32
    %2 = arith.cmpi ne, %1, %c0_i32_0 : i32
    scf.if %2 {
      %cst_62 = arith.constant 0.000000e+00 : f32
      %186 = vector.broadcast %cst_62 : f32 to vector<1x1xf32>
      %c0_63 = arith.constant 0 : index
      %c0_64 = arith.constant 0 : index
      %187 = vector.load %arg3[%c0_63, %c0_64] : memref<1x1xf32, #tpu.memory_space<vmem>>, vector<1x1xf32>
      tpu.vector_store %arg3[%c0_63, %c0_64], %186 {strides = array<i32>} : memref<1x1xf32, #tpu.memory_space<vmem>>, vector<1x1xf32>,
      %cst_65 = arith.constant 0.000000e+00 : f32
      %188 = vector.broadcast %cst_65 : f32 to vector<1x1xf32>
      %c0_66 = arith.constant 0 : index
      %c0_67 = arith.constant 0 : index
      %189 = vector.load %arg4[%c0_66, %c0_67] : memref<1x1xf32, #tpu.memory_space<vmem>>, vector<1x1xf32>
      tpu.vector_store %arg4[%c0_66, %c0_67], %188 {strides = array<i32>} : memref<1x1xf32, #tpu.memory_space<vmem>>, vector<1x1xf32>,
    } else {
    }
    %c0 = arith.constant 0 : index
    %c0_1 = arith.constant 0 : index
    %3 = vector.load %arg1[%c0, %c0_1] : memref<8x10xf32, #tpu.memory_space<vmem>>, vector<8x10xf32>
    %c0_2 = arith.constant 0 : index
    %c0_3 = arith.constant 0 : index
    %4 = vector.load %arg2[%c0_2, %c0_3] : memref<8x1xi32, #tpu.memory_space<vmem>>, vector<8x1xi32>
    %5 = tpu.iota {dimensions = array<i32: 0>} : vector<8x1xi32>
    %c8_i32 = arith.constant 8 : i32
    %6 = arith.muli %arg0, %c8_i32 : i32
    %7 = vector.broadcast %6 : i32 to vector<8x1xi32>
    %8 = arith.addi %5, %7 : vector<8x1xi32>
    %c8_i32_4 = arith.constant 8 : i32
    %9 = vector.broadcast %c8_i32_4 : i32 to vector<8x1xi32>
    %10 = arith.cmpi slt, %8, %9 : vector<8x1xi32>
    %cst = arith.constant dense<0xFF800000> : vector<8xf32>
    %11 = vector.multi_reduction <maximumf>, %3, %cst [1] : vector<8x10xf32> to vector<8xf32>
    %12 = vector.shape_cast %11 : vector<8xf32> to vector<8x1xf32>
    %13 = vector.broadcast %12 : vector<8x1xf32> to vector<8x10xf32>
    %14 = arith.subf %3, %13 : vector<8x10xf32>
    %15 = math.exp %14 : vector<8x10xf32>
    %cst_5 = arith.constant dense<0.000000e+00> : vector<8xf32>
    %16 = vector.multi_reduction <add>, %15, %cst_5 [1] : vector<8x10xf32> to vector<8xf32>
    %17 = vector.shape_cast %16 : vector<8xf32> to vector<8x1xf32>
    %18 = math.log %17 : vector<8x1xf32>
    %cst_6 = arith.constant dense<0.000000e+00> : vector<8xf32>
    %19 = vector.multi_reduction <add>, %14, %cst_6 [1] : vector<8x10xf32> to vector<8xf32>
    %20 = vector.shape_cast %19 : vector<8xf32> to vector<8x1xf32>
    %cst_7 = arith.constant 1.000000e+01 : f32
    %21 = vector.broadcast %cst_7 : f32 to vector<8x1xf32>
    %22 = arith.mulf %21, %18 : vector<8x1xf32>
    %23 = arith.subf %22, %20 : vector<8x1xf32>
    %24 = tpu.iota {dimensions = array<i32: 1>} : vector<8x10xi32>
    %25 = vector.broadcast %4 : vector<8x1xi32> to vector<8x10xi32>
    %26 = arith.cmpi eq, %24, %25 : vector<8x10xi32>
    %cst_8 = arith.constant 0.000000e+00 : f32
    %27 = vector.broadcast %cst_8 : f32 to vector<8x10xf32>
    %28 = arith.select %26, %14, %27 : vector<8x10xi1>, vector<8x10xf32>
    %cst_9 = arith.constant dense<0.000000e+00> : vector<8xf32>
    %29 = vector.multi_reduction <add>, %28, %cst_9 [1] : vector<8x10xf32> to vector<8xf32>
    %30 = vector.shape_cast %29 : vector<8xf32> to vector<8x1xf32>
    %31 = arith.subf %18, %30 : vector<8x1xf32>
    %cst_10 = arith.constant 0.000000e+00 : f32
    %32 = vector.broadcast %cst_10 : f32 to vector<8x1xf32>
    %33 = arith.subf %32, %31 : vector<8x1xf32>
    %34 = math.exp %33 : vector<8x1xf32>
    %cst_11 = arith.constant 1.000000e+00 : f32
    %35 = vector.broadcast %cst_11 : f32 to vector<8x1xf32>
    %36 = arith.subf %35, %34 : vector<8x1xf32>
    %cst_12 = arith.constant 2.500000e-01 : f32
    %37 = vector.broadcast %cst_12 : f32 to vector<8x1xf32>
    %38 = arith.mulf %37, %36 : vector<8x1xf32>
    %39 = arith.mulf %38, %36 : vector<8x1xf32>
    %40 = arith.mulf %39, %31 : vector<8x1xf32>
    %cst_13 = arith.constant 2.30258512 : f32
    %41 = vector.broadcast %cst_13 : f32 to vector<8x1xf32>
    %42 = arith.subf %40, %41 : vector<8x1xf32>
    %cst_14 = arith.constant 2.000000e+00 : f32
    %43 = vector.broadcast %cst_14 : f32 to vector<8x1xf32>
    %44 = arith.mulf %42, %43 : vector<8x1xf32>
    %cst_15 = arith.constant -0.735758901 : f32
    %45 = vector.broadcast %cst_15 : f32 to vector<8x1xf32>
    %46 = arith.maximumf %45, %44 : vector<8x1xf32>
    %cst_16 = arith.constant 5.000000e-01 : f32
    %47 = vector.broadcast %cst_16 : f32 to vector<8x1xf32>
    %48 = arith.mulf %47, %46 : vector<8x1xf32>
    %cst_17 = arith.constant 2.71828175 : f32
    %49 = vector.broadcast %cst_17 : f32 to vector<8x1xf32>
    %50 = arith.mulf %49, %48 : vector<8x1xf32>
    %cst_18 = arith.constant 1.000000e+00 : f32
    %51 = vector.broadcast %cst_18 : f32 to vector<8x1xf32>
    %52 = arith.addf %50, %51 : vector<8x1xf32>
    %cst_19 = arith.constant 2.000000e+00 : f32
    %53 = vector.broadcast %cst_19 : f32 to vector<8x1xf32>
    %54 = arith.mulf %53, %52 : vector<8x1xf32>
    %cst_20 = arith.constant 0.000000e+00 : f32
    %55 = vector.broadcast %cst_20 : f32 to vector<8x1xf32>
    %56 = arith.maximumf %54, %55 : vector<8x1xf32>
    %57 = math.sqrt %56 : vector<8x1xf32>
    %cst_21 = arith.constant -1.000000e+00 : f32
    %58 = vector.broadcast %cst_21 : f32 to vector<8x1xf32>
    %59 = arith.addf %58, %57 : vector<8x1xf32>
    %60 = arith.mulf %57, %57 : vector<8x1xf32>
    %cst_22 = arith.constant 0.333333343 : f32
    %61 = vector.broadcast %cst_22 : f32 to vector<8x1xf32>
    %62 = arith.mulf %60, %61 : vector<8x1xf32>
    %63 = arith.subf %59, %62 : vector<8x1xf32>
    %cst_23 = arith.constant 0.152777776 : f32
    %64 = vector.broadcast %cst_23 : f32 to vector<8x1xf32>
    %65 = arith.mulf %64, %57 : vector<8x1xf32>
    %66 = arith.mulf %65, %57 : vector<8x1xf32>
    %67 = arith.mulf %66, %57 : vector<8x1xf32>
    %68 = arith.addf %63, %67 : vector<8x1xf32>
    %cst_24 = arith.constant 0.000000e+00 : f32
    %69 = vector.broadcast %cst_24 : f32 to vector<8x1xf32>
    %70 = arith.maximumf %48, %69 : vector<8x1xf32>
    %71 = math.log1p %70 : vector<8x1xf32>
    %cst_25 = arith.constant 2.500000e-01 : f32
    %72 = vector.broadcast %cst_25 : f32 to vector<8x1xf32>
    %73 = arith.cmpf olt, %48, %72 : vector<8x1xf32>
    %74 = arith.select %73, %68, %71 : vector<8x1xi1>, vector<8x1xf32>
    %75 = math.exp %74 : vector<8x1xf32>
    %76 = arith.mulf %74, %75 : vector<8x1xf32>
    %77 = arith.subf %76, %48 : vector<8x1xf32>
    %cst_26 = arith.constant 1.000000e+00 : f32
    %78 = vector.broadcast %cst_26 : f32 to vector<8x1xf32>
    %79 = arith.addf %74, %78 : vector<8x1xf32>
    %80 = arith.mulf %75, %79 : vector<8x1xf32>
    %81 = arith.mulf %80, %79 : vector<8x1xf32>
    %cst_27 = arith.constant 2.000000e+00 : f32
    %82 = vector.broadcast %cst_27 : f32 to vector<8x1xf32>
    %83 = arith.addf %74, %82 : vector<8x1xf32>
    %cst_28 = arith.constant 5.000000e-01 : f32
    %84 = vector.broadcast %cst_28 : f32 to vector<8x1xf32>
    %85 = arith.mulf %84, %83 : vector<8x1xf32>
    %86 = arith.mulf %85, %77 : vector<8x1xf32>
    %87 = arith.subf %81, %86 : vector<8x1xf32>
    %88 = arith.mulf %77, %79 : vector<8x1xf32>
    %cst_29 = arith.constant 0.000000e+00 : f32
    %89 = vector.broadcast %cst_29 : f32 to vector<8x1xf32>
    %90 = arith.cmpf oeq, %87, %89 : vector<8x1xf32>
    %cst_30 = arith.constant 1.000000e+00 : f32
    %91 = vector.broadcast %cst_30 : f32 to vector<8x1xf32>
    %92 = arith.select %90, %91, %87 : vector<8x1xi1>, vector<8x1xf32>
    %93 = arith.divf %88, %92 : vector<8x1xf32>
    %94 = arith.subf %74, %93 : vector<8x1xf32>
    %95 = math.exp %94 : vector<8x1xf32>
    %96 = arith.mulf %94, %95 : vector<8x1xf32>
    %97 = arith.subf %96, %48 : vector<8x1xf32>
    %cst_31 = arith.constant 1.000000e+00 : f32
    %98 = vector.broadcast %cst_31 : f32 to vector<8x1xf32>
    %99 = arith.addf %94, %98 : vector<8x1xf32>
    %100 = arith.mulf %95, %99 : vector<8x1xf32>
    %101 = arith.mulf %100, %99 : vector<8x1xf32>
    %cst_32 = arith.constant 2.000000e+00 : f32
    %102 = vector.broadcast %cst_32 : f32 to vector<8x1xf32>
    %103 = arith.addf %94, %102 : vector<8x1xf32>
    %cst_33 = arith.constant 5.000000e-01 : f32
    %104 = vector.broadcast %cst_33 : f32 to vector<8x1xf32>
    %105 = arith.mulf %104, %103 : vector<8x1xf32>
    %106 = arith.mulf %105, %97 : vector<8x1xf32>
    %107 = arith.subf %101, %106 : vector<8x1xf32>
    %108 = arith.mulf %97, %99 : vector<8x1xf32>
    %cst_34 = arith.constant 0.000000e+00 : f32
    %109 = vector.broadcast %cst_34 : f32 to vector<8x1xf32>
    %110 = arith.cmpf oeq, %107, %109 : vector<8x1xf32>
    %cst_35 = arith.constant 1.000000e+00 : f32
    %111 = vector.broadcast %cst_35 : f32 to vector<8x1xf32>
    %112 = arith.select %110, %111, %107 : vector<8x1xi1>, vector<8x1xf32>
    %113 = arith.divf %108, %112 : vector<8x1xf32>
    %114 = arith.subf %94, %113 : vector<8x1xf32>
    %115 = math.exp %114 : vector<8x1xf32>
    %116 = arith.mulf %114, %115 : vector<8x1xf32>
    %117 = arith.subf %116, %48 : vector<8x1xf32>
    %cst_36 = arith.constant 1.000000e+00 : f32
    %118 = vector.broadcast %cst_36 : f32 to vector<8x1xf32>
    %119 = arith.addf %114, %118 : vector<8x1xf32>
    %120 = arith.mulf %115, %119 : vector<8x1xf32>
    %121 = arith.mulf %120, %119 : vector<8x1xf32>
    %cst_37 = arith.constant 2.000000e+00 : f32
    %122 = vector.broadcast %cst_37 : f32 to vector<8x1xf32>
    %123 = arith.addf %114, %122 : vector<8x1xf32>
    %cst_38 = arith.constant 5.000000e-01 : f32
    %124 = vector.broadcast %cst_38 : f32 to vector<8x1xf32>
    %125 = arith.mulf %124, %123 : vector<8x1xf32>
    %126 = arith.mulf %125, %117 : vector<8x1xf32>
    %127 = arith.subf %121, %126 : vector<8x1xf32>
    %128 = arith.mulf %117, %119 : vector<8x1xf32>
    %cst_39 = arith.constant 0.000000e+00 : f32
    %129 = vector.broadcast %cst_39 : f32 to vector<8x1xf32>
    %130 = arith.cmpf oeq, %127, %129 : vector<8x1xf32>
    %cst_40 = arith.constant 1.000000e+00 : f32
    %131 = vector.broadcast %cst_40 : f32 to vector<8x1xf32>
    %132 = arith.select %130, %131, %127 : vector<8x1xi1>, vector<8x1xf32>
    %133 = arith.divf %128, %132 : vector<8x1xf32>
    %134 = arith.subf %114, %133 : vector<8x1xf32>
    %135 = math.exp %134 : vector<8x1xf32>
    %136 = arith.mulf %134, %135 : vector<8x1xf32>
    %137 = arith.subf %136, %48 : vector<8x1xf32>
    %cst_41 = arith.constant 1.000000e+00 : f32
    %138 = vector.broadcast %cst_41 : f32 to vector<8x1xf32>
    %139 = arith.addf %134, %138 : vector<8x1xf32>
    %140 = arith.mulf %135, %139 : vector<8x1xf32>
    %141 = arith.mulf %140, %139 : vector<8x1xf32>
    %cst_42 = arith.constant 2.000000e+00 : f32
    %142 = vector.broadcast %cst_42 : f32 to vector<8x1xf32>
    %143 = arith.addf %134, %142 : vector<8x1xf32>
    %cst_43 = arith.constant 5.000000e-01 : f32
    %144 = vector.broadcast %cst_43 : f32 to vector<8x1xf32>
    %145 = arith.mulf %144, %143 : vector<8x1xf32>
    %146 = arith.mulf %145, %137 : vector<8x1xf32>
    %147 = arith.subf %141, %146 : vector<8x1xf32>
    %148 = arith.mulf %137, %139 : vector<8x1xf32>
    %cst_44 = arith.constant 0.000000e+00 : f32
    %149 = vector.broadcast %cst_44 : f32 to vector<8x1xf32>
    %150 = arith.cmpf oeq, %147, %149 : vector<8x1xf32>
    %cst_45 = arith.constant 1.000000e+00 : f32
    %151 = vector.broadcast %cst_45 : f32 to vector<8x1xf32>
    %152 = arith.select %150, %151, %147 : vector<8x1xi1>, vector<8x1xf32>
    %153 = arith.divf %148, %152 : vector<8x1xf32>
    %154 = arith.subf %134, %153 : vector<8x1xf32>
    %cst_46 = arith.constant 0.000000e+00 : f32
    %155 = vector.broadcast %cst_46 : f32 to vector<8x1xf32>
    %156 = arith.subf %155, %154 : vector<8x1xf32>
    %157 = math.exp %156 : vector<8x1xf32>
    %158 = arith.mulf %42, %157 : vector<8x1xf32>
    %159 = arith.mulf %154, %154 : vector<8x1xf32>
    %cst_47 = arith.constant 5.000000e-01 : f32
    %160 = vector.broadcast %cst_47 : f32 to vector<8x1xf32>
    %161 = arith.mulf %160, %159 : vector<8x1xf32>
    %162 = arith.addf %158, %161 : vector<8x1xf32>
    %c0_48 = arith.constant 0 : index
    %c0_49 = arith.constant 0 : index
    %163 = vector.load %arg3[%c0_48, %c0_49] : memref<1x1xf32, #tpu.memory_space<vmem>>, vector<1x1xf32>
    %cst_50 = arith.constant 0.000000e+00 : f32
    %164 = vector.broadcast %cst_50 : f32 to vector<8x1xf32>
    %165 = arith.select %10, %23, %164 : vector<8x1xi1>, vector<8x1xf32>
    %166 = vector.shape_cast %165 : vector<8x1xf32> to vector<1x8x1xf32>
    %cst_51 = arith.constant dense<0.000000e+00> : vector<1xf32>
    %167 = vector.multi_reduction <add>, %166, %cst_51 [1, 2] : vector<1x8x1xf32> to vector<1xf32>
    %168 = vector.shape_cast %167 : vector<1xf32> to vector<1x1x1xf32>
    %169 = vector.extract %168[0, 0, 0] : f32 from vector<1x1x1xf32>
    %170 = vector.broadcast %169 : f32 to vector<1x1xf32>
    %171 = arith.addf %163, %170 : vector<1x1xf32>
    %c0_52 = arith.constant 0 : index
    %c0_53 = arith.constant 0 : index
    %172 = vector.load %arg3[%c0_52, %c0_53] : memref<1x1xf32, #tpu.memory_space<vmem>>, vector<1x1xf32>
    tpu.vector_store %arg3[%c0_52, %c0_53], %171 {strides = array<i32>} : memref<1x1xf32, #tpu.memory_space<vmem>>, vector<1x1xf32>,
    %c0_54 = arith.constant 0 : index
    %c0_55 = arith.constant 0 : index
    %173 = vector.load %arg4[%c0_54, %c0_55] : memref<1x1xf32, #tpu.memory_space<vmem>>, vector<1x1xf32>
    %cst_56 = arith.constant 0.000000e+00 : f32
    %174 = vector.broadcast %cst_56 : f32 to vector<8x1xf32>
    %175 = arith.select %10, %162, %174 : vector<8x1xi1>, vector<8x1xf32>
    %176 = vector.shape_cast %175 : vector<8x1xf32> to vector<1x8x1xf32>
    %cst_57 = arith.constant dense<0.000000e+00> : vector<1xf32>
    %177 = vector.multi_reduction <add>, %176, %cst_57 [1, 2] : vector<1x8x1xf32> to vector<1xf32>
    %178 = vector.shape_cast %177 : vector<1xf32> to vector<1x1x1xf32>
    %179 = vector.extract %178[0, 0, 0] : f32 from vector<1x1x1xf32>
    %180 = vector.broadcast %179 : f32 to vector<1x1xf32>
    %181 = arith.addf %173, %180 : vector<1x1xf32>
    %c0_58 = arith.constant 0 : index
    %c0_59 = arith.constant 0 : index
    %182 = vector.load %arg4[%c0_58, %c0_59] : memref<1x1xf32, #tpu.memory_space<vmem>>, vector<1x1xf32>
    tpu.vector_store %arg4[%c0_58, %c0_59], %181 {strides = array<i32>} : memref<1x1xf32, #tpu.memory_space<vmem>>, vector<1x1xf32>,
    %c0_i32_60 = arith.constant 0 : i32
    %183 = arith.cmpi eq, %arg0, %c0_i32_60 : i32
    %184 = arith.extui %183 : i1 to i32
    %c0_i32_61 = arith.constant 0 : i32
    %185 = arith.cmpi ne, %184, %c0_i32_61 : i32
    scf.if %185 {
      %c0_62 = arith.constant 0 : index
      %c0_63 = arith.constant 0 : index
      %186 = vector.load %arg3[%c0_62, %c0_63] : memref<1x1xf32, #tpu.memory_space<vmem>>, vector<1x1xf32>
      %cst_64 = arith.constant 1.250000e-01 : f32
      %187 = vector.broadcast %cst_64 : f32 to vector<1x1xf32>
      %188 = arith.mulf %186, %187 : vector<1x1xf32>
      %c0_65 = arith.constant 0 : index
      %c0_66 = arith.constant 0 : index
      %189 = vector.load %arg4[%c0_65, %c0_66] : memref<1x1xf32, #tpu.memory_space<vmem>>, vector<1x1xf32>
      %cst_67 = arith.constant 1.250000e-01 : f32
      %190 = vector.broadcast %cst_67 : f32 to vector<1x1xf32>
      %191 = arith.mulf %189, %190 : vector<1x1xf32>
      %cst_68 = arith.constant 1.000000e-03 : f32
      %192 = vector.broadcast %cst_68 : f32 to vector<1x1xf32>
      %193 = arith.mulf %188, %192 : vector<1x1xf32>
      %cst_69 = arith.constant 9.900000e-01 : f32
      %194 = vector.broadcast %cst_69 : f32 to vector<1x1xf32>
      %195 = arith.mulf %194, %191 : vector<1x1xf32>
      %196 = arith.addf %193, %195 : vector<1x1xf32>
      %c0_70 = arith.constant 0 : index
      %c0_71 = arith.constant 0 : index
      %197 = vector.load %arg3[%c0_70, %c0_71] : memref<1x1xf32, #tpu.memory_space<vmem>>, vector<1x1xf32>
      tpu.vector_store %arg3[%c0_70, %c0_71], %196 {strides = array<i32>} : memref<1x1xf32, #tpu.memory_space<vmem>>, vector<1x1xf32>,
      %198 = math.exp %191 : vector<1x1xf32>
      %c0_72 = arith.constant 0 : index
      %c0_73 = arith.constant 0 : index
      %199 = vector.load %arg4[%c0_72, %c0_73] : memref<1x1xf32, #tpu.memory_space<vmem>>, vector<1x1xf32>
      tpu.vector_store %arg4[%c0_72, %c0_73], %198 {strides = array<i32>} : memref<1x1xf32, #tpu.memory_space<vmem>>, vector<1x1xf32>,
    } else {
    }
    return
  }
  func.func @transform_0(%arg0: i32) -> (i32, i32) {
    %c0_i32 = arith.constant 0 : i32
    %c0_i32_0 = arith.constant 0 : i32
    return %arg0, %c0_i32 : i32, i32
  }
  func.func @transform_1(%arg0: i32) -> (i32, i32) {
    %c0_i32 = arith.constant 0 : i32
    %c0_i32_0 = arith.constant 0 : i32
    return %arg0, %c0_i32 : i32, i32
  }
  func.func @transform_2(%arg0: i32) -> (i32, i32) {
    %c0_i32 = arith.constant 0 : i32
    %c0_i32_0 = arith.constant 0 : i32
    %c0_i32_1 = arith.constant 0 : i32
    return %c0_i32, %c0_i32_0 : i32, i32
  }
  func.func @transform_3(%arg0: i32) -> (i32, i32) {
    %c0_i32 = arith.constant 0 : i32
    %c0_i32_0 = arith.constant 0 : i32
    %c0_i32_1 = arith.constant 0 : i32
    return %c0_i32, %c0_i32_0 : i32, i32
  }
}

</mosaic_0001>

<bundles_post_ra>
// kernel: tpu_custom_call.1
= control target key start
LH: loop header
LB: loop body
LE: loop exit
PB: predicated region body
PF: predicated region fallthrough
CT: control target
= control target key end

     0   :  { %9 = vsyncpa [#allocation3], 0  ;;  %vm30_vm0 = vcmask 80896   ;;  %s463_s0 = inlined_call_operand.vmem [shape: f32[8,10], index: 0, kind: input, shape index: {}]   ;;  %s464_s1 = inlined_call_operand.vmem [shape: s32[8,1], index: 1, kind: input, shape index: {}]   ;;  %s465_s2 = inlined_call_operand.hbm [shape: f32[1,1], index: 2, kind: output, shape index: {0}]   ;;  %s466_s3 = inlined_call_operand.hbm [shape: f32[1,1], index: 3, kind: output, shape index: {1}]  }
   0x1   :  { %v22_v0 = vld [vmem:[%s463_s0] sm:$0xff] }
   0x2   :  { %10 = vsyncpa [#allocation5], 0  ;;  %v31_v1 = vsel %vm30_vm0, %v22_v0, -inf  ;;  %v402_v2 = vmov 0   ;;  %v23_v3 = vld [vmem:[%s464_s1] sm:$0xff]  ;;  %v47_v10 = vlaneseq  ;;  %vm234_vm2 = vcmask 7168  }
   0x3   :  { %319 = vset.pattern.permute.xlu0 %v402_v2  ;;  %vm19_vm12 = vcmask 0   ;;  %s404_s16 = smov [#allocation2]   ;;  %s285_s20 = sshll.u32 %s465_s2, 4  ;;  %s286_s20 = int_to_ptr.hbm [resolvable:$true] %s285_s20 }
   0x4   :  { %32 = vmax.xlane.f32.xlu0 %v31_v1  ;;  %v48_v11 = vand.u32 127, %v47_v10  ;;  %s283_s17 = sshll.u32 %s404_s16, 4  ;;  %s405_s21 = smov [#allocation4]   ;;  %s284_s17 = int_to_ptr.vmem [resolvable:$true] %s283_s17 }
   0x5   :  { %s294_s22 = sshll.u32 %s405_s21, 4  ;;  %s296_s25 = sshll.u32 %s466_s3, 4  ;;  %s295_s22 = int_to_ptr.vmem [resolvable:$true] %s294_s22  ;;  %s297_s25 = int_to_ptr.hbm [resolvable:$true] %s296_s25 }
  0x18   :  { %50 = vperm.xlu0 %319, %v23_v3  }
  0x77   :  { %v33_v4 = vpop.xlane.xlu0 %32 }
  0x78   :  { %v34_v5 = vsub.f32 %v22_v0, %v33_v4 }
  0x7a   :  { %v35_v6 = vmul.f32 1.442695, %v34_v5  ;;  %v42_v7 = vsel %vm30_vm0, %v34_v5, 0.0 }
  0x7b   :  { %43 = vadd.xlane.f32.xlu2 %v42_v7 }
  0x7c   :  { %320 = vpow2.f32 %v35_v6 }
  0x82   :  { %v321_v8 = vpop.eup %320 }
  0x83   :  { %v37_v9 = vsel %vm30_vm0, %v321_v8, 0.0 }
  0x84   :  { %38 = vadd.xlane.f32.xlu1 %v37_v9 }
  0x8a   :  { %v51_v12 = vpop.permute.xlu0 %50 }
  0x8b   :  { %vm52_vm1 = vcmp.eq.s32.totalorder %v48_v11, %v51_v12 }
  0x8c   :  { %v53_v13 = vsel %vm52_vm1, %v34_v5, 0.0 }
  0x8d   :  { %v54_v14 = vsel %vm30_vm0, %v53_v13, 0.0 }
  0x8e   :  { %55 = vadd.xlane.f32.xlu1 %v54_v14 }
  0xee   :  { %v44_v20 = vpop.xlane.xlu2 %43 }
  0xf7   :  { %v39_v15 = vpop.xlane.xlu1 %38 }
  0xf8   :  { %322 = vlog2.f32 %v39_v15 }
  0xfe   :  { %v323_v16 = vpop.eup %322 }
  0xff   :  { %v41_v17 = vmul.f32 0.6931472, %v323_v16 }
 0x101   :  { %v45_v18 = vmul.f32 10.0, %v41_v17  ;;  %v56_v19 = vpop.xlane.xlu1 %55 }
 0x102   :  { %v57_v21 = vsub.f32 %v41_v17, %v56_v19 }
 0x103   :  { %v46_v22 = vsub.f32 %v45_v18, %v44_v20 }
 0x104   :  { %v58_v23 = vsub.f32 0.0, %v57_v21 }
 0x105   :  { %v235_v24 = vsel %vm234_vm2, %v46_v22, 0.0 }
 0x106   :  { %v59_v25 = vmul.f32 1.442695, %v58_v23  ;;  %236 = vadd.xlane.f32.xlu2 %v235_v24 }
 0x108   :  { %324 = vpow2.f32 %v59_v25 }
 0x10e   :  { %v325_v26 = vpop.eup %324 }
 0x10f   :  { %v61_v27 = vsub.f32 1.0, %v325_v26 }
 0x111   :  { %v62_v28 = vmul.f32 0.25, %v61_v27 }
 0x113   :  { %v63_v29 = vmul.f32 %v62_v28, %v61_v27  ;;  %v403_v27 = vmov 0.0  }
 0x114   :  { %20 = vst.msk [vmem:[#allocation2] sm:$0x1] %vm19_vm12, %v403_v27 }
 0x115   :  { %v64_v30 = vmul.f32 %v63_v29, %v57_v21  ;;  %21 = vst.msk [vmem:[#allocation4] sm:$0x1] %vm19_vm12, %v403_v27 }
 0x117   :  { %v437_v31 = vadd.f32 -2.3025851, %v64_v30 }
 0x119   :  { %v66_v32 = vmul.f32 2.0, %v437_v31 }
 0x11b   :  { %v67_v33 = vmax.f32 %v66_v32, -0.7357589 }
 0x11d   :  { %v440_v34 = vmul.f32 0.5, %v67_v33 }
 0x11f   :  { %v69_v35 = vmul.f32 2.7182817, %v440_v34  ;;  %v93_v41 = vmax.f32 %v440_v34, 0.0  ;;  %vm103_vm6 = vcmp.lt.f32.partialorder %v440_v34, 0.25 }
 0x121   :  { %v70_v36 = vadd.f32 1.0, %v69_v35  ;;  %v94_v44 = vadd.f32 1.0, %v93_v41  ;;  %v97_v49 = vmul.f32 -0.5, %v93_v41  ;;  %v100_v59 = vand.u32 2147483647, %v93_v41 }
 0x123   :  { %v71_v37 = vmul.f32 2.0, %v70_v36  ;;  %v98_v55 = vadd.f32 1.0, %v97_v49  ;;  %vm101_vm5 = vcmp.lt.f32.partialorder %v100_v59, 0.0004427343 }
 0x125   :  { %v72_v38 = vmax.f32 %v71_v37, 0.0  ;;  %v99_v63 = vmul.f32 %v98_v55, %v93_v41 }
 0x127   :  { %326 = vrsqrt.f32 %v72_v38  ;;  %vm80_vm3 = vcmp.eq.f32.partialorder %v72_v38, inf  ;;  %v83_v48 = vand.u32 2147483648, %v72_v38  ;;  %vm82_vm4 = vcmp.eq.f32.partialorder %v72_v38, 0.0 }
 0x128   :  { %328 = vlog2.f32 %v94_v44 }
 0x12d   :  { %v327_v39 = vpop.eup %326 }
 0x12e   :  { %v74_v40 = vmul.f32 %v327_v39, %v72_v38  ;;  %v329_v52 = vpop.eup %328 }
 0x12f   :  { %v96_v60 = vmul.f32 0.6931472, %v329_v52 }
 0x130   :  { %v75_v42 = vmul.f32 %v327_v39, %v74_v40 }
 0x131   :  { %v102_v1 = vsel %vm101_vm5, %v99_v63, %v96_v60 }
 0x132   :  { %v76_v43 = vmul.f32 0.5, %v75_v42 }
 0x134   :  { %v77_v45 = vsub.f32 1.5, %v76_v43 }
 0x136   :  { %v78_v46 = vmul.f32 %v327_v39, %v77_v45 }
 0x138   :  { %v79_v47 = vmul.f32 %v78_v46, %v72_v38 }
 0x13a   :  { %v81_v50 = vsel %vm80_vm3, %v72_v38, %v79_v47 }
 0x13b   :  { %v84_v51 = vsel %vm82_vm4, %v83_v48, %v81_v50 }
 0x13c   :  { %v86_v53 = vmul.f32 %v84_v51, %v84_v51  ;;  %v89_v54 = vmul.f32 0.15277778, %v84_v51  ;;  %v85_v56 = vadd.f32 -1.0, %v84_v51 }
 0x13e   :  { %v87_v57 = vmul.f32 0.33333334, %v86_v53  ;;  %v90_v58 = vmul.f32 %v89_v54, %v84_v51 }
 0x140   :  { %v88_v61 = vsub.f32 %v85_v56, %v87_v57  ;;  %v91_v62 = vmul.f32 %v90_v58, %v84_v51 }
 0x142   :  { %v92_v0 = vadd.f32 %v91_v62, %v88_v61 }
 0x144   :  { %v104_v2 = vsel %vm103_vm6, %v92_v0, %v102_v1 }
 0x145   :  { %v105_v3 = vmul.f32 1.442695, %v104_v2  ;;  %v109_v4 = vadd.f32 1.0, %v104_v2  ;;  %v112_v5 = vadd.f32 2.0, %v104_v2 }
 0x147   :  { %330 = vpow2.f32 %v105_v3  ;;  %v113_v10 = vmul.f32 0.5, %v112_v5 }
 0x14d   :  { %v331_v6 = vpop.eup %330 }
 0x14e   :  { %v107_v7 = vmul.f32 %v331_v6, %v104_v2  ;;  %v110_v8 = vmul.f32 %v331_v6, %v109_v4 }
 0x150   :  { %v108_v9 = vsub.f32 %v107_v7, %v440_v34  ;;  %v111_v11 = vmul.f32 %v110_v8, %v109_v4 }
 0x152   :  { %v114_v12 = vmul.f32 %v113_v10, %v108_v9  ;;  %v116_v23 = vmul.f32 %v109_v4, %v108_v9 }
 0x154   :  { %v115_v13 = vsub.f32 %v111_v11, %v114_v12 }
 0x156   :  { %vm117_vm7 = vcmp.eq.f32.partialorder %v115_v13, 0.0 }
 0x157   :  { %v118_v14 = vsel %vm117_vm7, 1.0, %v115_v13 }
 0x158   :  { %332 = vrcp.f32 %v118_v14  ;;  %v130_v18 = vand.u32 2147483648, %v118_v14  ;;  %v128_v20 = vand.u32 2147483647, %v118_v14  ;;  %vm124_vm9 = vweird.f32 %v118_v14 }
 0x15a   :  { %v131_v22 = vor.u32 1.1754944e-38, %v130_v18  ;;  %vm129_vm11 = vcmp.eq.f32.partialorder %v128_v20, 8.507059e+37  ;;  %v232_v18 = vld [vmem:[#allocation2] sm:$0x1] }
 0x15e   :  { %v333_v15 = vpop.eup %332 }
 0x15f   :  { %v120_v16 = vmul.f32 %v333_v15, %v118_v14  ;;  %vm125_vm8 = vweird.f32 %v333_v15 }
 0x160   :  { %vm126_vm10 = vmor %vm124_vm9, %vm125_vm8 }
 0x161   :  { %v121_v17 = vsub.f32 1.0, %v120_v16 }
 0x163   :  { %v122_v19 = vmul.f32 %v333_v15, %v121_v17 }
 0x165   :  { %v123_v21 = vadd.f32 %v333_v15, %v122_v19 }
 0x167   :  { %v127_v24 = vsel %vm126_vm10, %v333_v15, %v123_v21 }
 0x168   :  { %v132_v25 = vsel %vm129_vm11, %v131_v22, %v127_v24 }
 0x169   :  { %v133_v26 = vmul.f32 %v132_v25, %v116_v23 }
 0x16b   :  { %v134_v28 = vsub.f32 %v104_v2, %v133_v26 }
 0x16d   :  { %v135_v29 = vmul.f32 1.442695, %v134_v28  ;;  %v139_v30 = vadd.f32 1.0, %v134_v28  ;;  %v142_v32 = vadd.f32 2.0, %v134_v28 }
 0x16f   :  { %334 = vpow2.f32 %v135_v29  ;;  %v143_v38 = vmul.f32 0.5, %v142_v32 }
 0x175   :  { %v335_v33 = vpop.eup %334 }
 0x176   :  { %v137_v35 = vmul.f32 %v335_v33, %v134_v28  ;;  %v140_v36 = vmul.f32 %v335_v33, %v139_v30 }
 0x178   :  { %v138_v37 = vsub.f32 %v137_v35, %v440_v34  ;;  %v141_v40 = vmul.f32 %v140_v36, %v139_v30 }
 0x179   :  { %v237_v39 = vpop.xlane.xlu2 %236 }
 0x17a   :  { %v144_v41 = vmul.f32 %v143_v38, %v138_v37  ;;  %v238_v42 = vrot.slane %v237_v39, 4  ;;  %v146_v58 = vmul.f32 %v139_v30, %v138_v37 }
 0x17c   :  { %v145_v43 = vsub.f32 %v141_v40, %v144_v41  ;;  %v239_v44 = vadd.f32 %v238_v42, %v237_v39 }
 0x17e   :  { %vm147_vm13 = vcmp.eq.f32.partialorder %v145_v43, 0.0  ;;  %v240_v45 = vrot.slane %v239_v44, 2 }
 0x17f   :  { %v148_v46 = vsel %vm147_vm13, 1.0, %v145_v43 }
 0x180   :  { %336 = vrcp.f32 %v148_v46  ;;  %v241_v47 = vadd.f32 %v240_v45, %v239_v44  ;;  %v160_v53 = vand.u32 2147483648, %v148_v46  ;;  %v158_v55 = vand.u32 2147483647, %v148_v46 }
 0x181   :  { %vm154_vm15 = vweird.f32 %v148_v46 }
 0x182   :  { %v242_v48 = vrot.slane %v241_v47, 1  ;;  %v161_v57 = vor.u32 1.1754944e-38, %v160_v53  ;;  %vm159_vm1 = vcmp.eq.f32.partialorder %v158_v55, 8.507059e+37 }
 0x184   :  { %v243_v49 = vadd.f32 %v242_v48, %v241_v47 }
 0x186   :  { %v337_v50 = vpop.eup %336  ;;  %311 = vpush %v243_v49 }
 0x187   :  { %v150_v51 = vmul.f32 %v337_v50, %v148_v46  ;;  %vm155_vm14 = vweird.f32 %v337_v50 }
 0x188   :  { %vm156_vm0 = vmor %vm154_vm15, %vm155_vm14 }
 0x189   :  { %v151_v52 = vsub.f32 1.0, %v150_v51 }
 0x18b   :  { %v152_v54 = vmul.f32 %v337_v50, %v151_v52 }
 0x18d   :  { %v153_v56 = vadd.f32 %v337_v50, %v152_v54 }
 0x18f   :  { %v157_v59 = vsel %vm156_vm0, %v337_v50, %v153_v56 }
 0x190   :  { %v162_v60 = vsel %vm159_vm1, %v161_v57, %v157_v59 }
 0x191   :  { %v163_v61 = vmul.f32 %v162_v60, %v146_v58 }
 0x193   :  { %v164_v62 = vsub.f32 %v134_v28, %v163_v61 }
 0x195   :  { %v165_v63 = vmul.f32 1.442695, %v164_v62  ;;  %v169_v0 = vadd.f32 1.0, %v164_v62  ;;  %v172_v1 = vadd.f32 2.0, %v164_v62 }
 0x197   :  { %338 = vpow2.f32 %v165_v63  ;;  %v173_v6 = vmul.f32 0.5, %v172_v1 }
 0x19d   :  { %v339_v2 = vpop.eup %338 }
 0x19e   :  { %v167_v3 = vmul.f32 %v339_v2, %v164_v62  ;;  %v170_v4 = vmul.f32 %v339_v2, %v169_v0 }
 0x1a0   :  { %v168_v5 = vsub.f32 %v167_v3, %v440_v34  ;;  %v171_v7 = vmul.f32 %v170_v4, %v169_v0  ;;  %v249_v4 = vld [vmem:[#allocation4] sm:$0x1] }
 0x1a2   :  { %v174_v8 = vmul.f32 %v173_v6, %v168_v5  ;;  %v176_v20 = vmul.f32 %v169_v0, %v168_v5 }
 0x1a4   :  { %v175_v9 = vsub.f32 %v171_v7, %v174_v8 }
 0x1a6   :  { %vm177_vm3 = vcmp.eq.f32.partialorder %v175_v9, 0.0 }
 0x1a7   :  { %v178_v10 = vsel %vm177_vm3, 1.0, %v175_v9 }
 0x1a8   :  { %340 = vrcp.f32 %v178_v10  ;;  %v190_v14 = vand.u32 2147483648, %v178_v10  ;;  %v188_v16 = vand.u32 2147483647, %v178_v10  ;;  %vm184_vm5 = vweird.f32 %v178_v10 }
 0x1aa   :  { %v191_v19 = vor.u32 1.1754944e-38, %v190_v14  ;;  %vm189_vm7 = vcmp.eq.f32.partialorder %v188_v16, 8.507059e+37 }
 0x1ae   :  { %v341_v11 = vpop.eup %340 }
 0x1af   :  { %v180_v12 = vmul.f32 %v341_v11, %v178_v10  ;;  %vm185_vm4 = vweird.f32 %v341_v11 }
 0x1b0   :  { %vm186_vm6 = vmor %vm184_vm5, %vm185_vm4 }
 0x1b1   :  { %v181_v13 = vsub.f32 1.0, %v180_v12 }
 0x1b3   :  { %v182_v15 = vmul.f32 %v341_v11, %v181_v13 }
 0x1b5   :  { %v183_v17 = vadd.f32 %v341_v11, %v182_v15 }
 0x1b7   :  { %s312_s0 = spop %311  ;;  %v187_v21 = vsel %vm186_vm6, %v341_v11, %v183_v17 }
 0x1b8   :  { %v245_v22 = vstv %s312_s0  ;;  %v192_v23 = vsel %vm189_vm7, %v191_v19, %v187_v21 }
 0x1b9   :  { %v246_v24 = vadd.f32 %v245_v22, %v232_v18  ;;  %v193_v25 = vmul.f32 %v192_v23, %v176_v20 }
 0x1bb   :  { %248 = vst.msk [vmem:[#allocation2] sm:$0x1] %vm19_vm12, %v246_v24  ;;  %v194_v26 = vsub.f32 %v164_v62, %v193_v25 }
 0x1bd   :  { %v195_v27 = vmul.f32 1.442695, %v194_v26  ;;  %v199_v28 = vadd.f32 1.0, %v194_v26  ;;  %v202_v29 = vadd.f32 2.0, %v194_v26 }
 0x1bf   :  { %342 = vpow2.f32 %v195_v27  ;;  %v203_v36 = vmul.f32 0.5, %v202_v29 }
 0x1c5   :  { %v343_v30 = vpop.eup %342 }
 0x1c6   :  { %v197_v32 = vmul.f32 %v343_v30, %v194_v26  ;;  %v200_v33 = vmul.f32 %v343_v30, %v199_v28 }
 0x1c8   :  { %v198_v35 = vsub.f32 %v197_v32, %v440_v34  ;;  %v201_v37 = vmul.f32 %v200_v33, %v199_v28 }
 0x1ca   :  { %v204_v38 = vmul.f32 %v203_v36, %v198_v35  ;;  %v206_v49 = vmul.f32 %v199_v28, %v198_v35 }
 0x1cc   :  { %v205_v39 = vsub.f32 %v201_v37, %v204_v38 }
 0x1ce   :  { %vm207_vm8 = vcmp.eq.f32.partialorder %v205_v39, 0.0 }
 0x1cf   :  { %v208_v40 = vsel %vm207_vm8, 1.0, %v205_v39 }
 0x1d0   :  { %344 = vrcp.f32 %v208_v40  ;;  %v220_v44 = vand.u32 2147483648, %v208_v40  ;;  %v218_v46 = vand.u32 2147483647, %v208_v40  ;;  %vm214_vm10 = vweird.f32 %v208_v40 }
 0x1d2   :  { %v221_v48 = vor.u32 1.1754944e-38, %v220_v44  ;;  %vm219_vm13 = vcmp.eq.f32.partialorder %v218_v46, 8.507059e+37 }
 0x1d6   :  { %v345_v41 = vpop.eup %344 }
 0x1d7   :  { %v210_v42 = vmul.f32 %v345_v41, %v208_v40  ;;  %vm215_vm9 = vweird.f32 %v345_v41 }
 0x1d8   :  { %vm216_vm11 = vmor %vm214_vm10, %vm215_vm9 }
 0x1d9   :  { %v211_v43 = vsub.f32 1.0, %v210_v42 }
 0x1db   :  { %v212_v45 = vmul.f32 %v345_v41, %v211_v43 }
 0x1dd   :  { %v213_v47 = vadd.f32 %v345_v41, %v212_v45 }
 0x1df   :  { %v217_v34 = vsel %vm216_vm11, %v345_v41, %v213_v47 }
 0x1e0   :  { %v222_v50 = vsel %vm219_vm13, %v221_v48, %v217_v34 }
 0x1e1   :  { %v223_v51 = vmul.f32 %v222_v50, %v206_v49 }
 0x1e3   :  { %v224_v52 = vsub.f32 %v194_v26, %v223_v51 }
 0x1e5   :  { %v225_v53 = vsub.f32 0.0, %v224_v52  ;;  %v229_v55 = vmul.f32 %v224_v52, %v224_v52 }
 0x1e7   :  { %v226_v54 = vmul.f32 1.442695, %v225_v53  ;;  %v230_v58 = vmul.f32 0.5, %v229_v55 }
 0x1e9   :  { %346 = vpow2.f32 %v226_v54 }
 0x1ef   :  { %v347_v56 = vpop.eup %346 }
 0x1f0   :  { %v228_v57 = vmul.f32 %v347_v56, %v437_v31  ;;  %v267_v31 = vld [vmem:[#allocation2] sm:$0x1] }
 0x1f1   :  { %v268_v7 = vmul.f32 0.125, %v267_v31 }
 0x1f2   :  { %v231_v59 = vadd.f32 %v230_v58, %v228_v57 }
 0x1f3   :  { %v271_v10 = vmul.f32 0.001, %v268_v7 }
 0x1f4   :  { %v251_v60 = vsel %vm234_vm2, %v231_v59, 0.0 }
 0x1f5   :  { %252 = vadd.xlane.f32.xlu1 %v251_v60 }
 0x268   :  { %v253_v61 = vpop.xlane.xlu1 %252 }
 0x269   :  { %v254_v62 = vrot.slane %v253_v61, 4 }
 0x26b   :  { %v255_v63 = vadd.f32 %v254_v62, %v253_v61 }
 0x26d   :  { %v256_v0 = vrot.slane %v255_v63, 2 }
 0x26f   :  { %v257_v1 = vadd.f32 %v256_v0, %v255_v63 }
 0x271   :  { %v258_v2 = vrot.slane %v257_v1, 1 }
 0x273   :  { %v259_v3 = vadd.f32 %v258_v2, %v257_v1 }
 0x275   :  { %313 = vpush %v259_v3 }
 0x2a6   :  { %s314_s1 = spop %313 }
 0x2a7   :  { %v261_v5 = vstv %s314_s1 }
 0x2a8   :  { %v262_v6 = vadd.f32 %v261_v5, %v249_v4 }
 0x2aa   :  { %263 = vst.msk [vmem:[#allocation4] sm:$0x1] %vm19_vm12, %v262_v6 }
 0x2b1   :  { %v269_v8 = vld [vmem:[#allocation4] sm:$0x1] }
 0x2b2   :  { %v270_v9 = vmul.f32 0.125, %v269_v8 }
 0x2b4   :  { %v272_v11 = vmul.f32 0.99, %v270_v9  ;;  %v275_v12 = vmul.f32 1.442695, %v270_v9 }
 0x2b6   :  { %v273_v13 = vadd.f32 %v272_v11, %v271_v10  ;;  %348 = vpow2.f32 %v275_v12 }
 0x2b8   :  { %274 = vst.msk [vmem:[#allocation2] sm:$0x1] %vm19_vm12, %v273_v13 }
 0x2b9   :  { %288 = dma.vmem_to_hbm [thread:$0]  %s284_s17, 16, %s286_s20, [#allocation3]  }
 0x2bc   :  { %v349_v14 = vpop.eup %348 }
 0x2bd   :  { %277 = vst.msk [vmem:[#allocation4] sm:$0x1] %vm19_vm12, %v349_v14 }
 0x2be   :  { %299 = dma.vmem_to_hbm [thread:$0]  %s295_s22, 16, %s297_s25, [#allocation5]  }
 0x2bf   :  { %398 = dma.done.wait [#allocation3], 16  }
 0x2c0   :  { %399 = vsyncadd [#allocation3], 4294967280 }
 0x2c1   :  { %400 = dma.done.wait [#allocation5], 16  }
 0x2c2   :  { %401 = vsyncadd [#allocation5], 4294967280 }
 0x2c3   :  { %308 = vsyncpa [#allocation3], 1 }
 0x2c4   :  { %309 = vsyncpa [#allocation5], 1 }

</bundles_post_ra>
